<compile_context>
chip_gen: v6e
topology: v6e:2x2x1
jax: 0.10.0
libtpu: 0.0.40
codegen_flags: <defaults>
</compile_context>

<pallas_src>
import functools

import jax
import jax.numpy as jnp
from jax.experimental import pallas as pl
from jax.experimental.pallas import tpu as pltpu


# ---------------------------------------------------------------------------
# Kernels
# ---------------------------------------------------------------------------

def _bn_kernel(x_ref, p_ref, o_ref):
    """pad_pixels == 0 path: plain per-channel affine on (cblk, H*W) blocks."""
    s = p_ref[:, 0:1]                                   # (cblk, 1) f32
    b = p_ref[:, 1:2]                                   # (cblk, 1) f32
    o_ref[...] = (x_ref[...].astype(jnp.float32) * s + b).astype(o_ref.dtype)


def _bn_pad_kernel(x_ref, p_ref, o_ref, *, pad, H, W):
    """
    x_ref: (cblk, H*W)     flattened per-channel planes (lane-dense)
    p_ref: (cblk, 2)       [:, 0] = scale, [:, 1] = shift (f32)
    o_ref: (cblk, Hp*Wp)   flattened padded planes (lane-dense)
    """
    Wp = W + 2 * pad
    cblk, hpwp = o_ref.shape

    s = p_ref[:, 0:1]                                   # (cblk, 1) f32
    b = p_ref[:, 1:2]                                   # (cblk, 1) f32 == border value

    # Interior FMA in f32 over the whole flattened plane (full lane width),
    # cast once to the output dtype.
    y = (x_ref[...].astype(jnp.float32) * s + b).astype(o_ref.dtype)

    # Fill the whole output block with the border value (a lane splat, no f32
    # temporary), then overwrite the interior row by row.  The double-written
    # interior lanes are VMEM-side only; the kernel is HBM-DMA bound so the
    # extra masked stores are hidden.
    o_ref[...] = jnp.broadcast_to(b, (cblk, hpwp)).astype(o_ref.dtype)

    # TODO(synk): for very large H (>~128) switch this static unroll to a
    # pl.loop with a VMEM-staged `y` to bound code size.
    for r in range(H):
        dst = (r + pad) * Wp + pad
        o_ref[:, dst:dst + W] = y[:, r * W:(r + 1) * W]


# ---------------------------------------------------------------------------
# Block-size selection (tile-padding aware)
# ---------------------------------------------------------------------------

def _round_up(v, m):
    return -(-v // m) * m


def _tile_bytes(rows, cols, itemsize):
    """VMEM footprint of a (rows, cols) block after (sublane, lane) tiling."""
    sublane = 8 * max(1, 4 // itemsize)        # 8 for f32, 16 for bf16, 32 for int8
    return _round_up(max(rows, 1), sublane) * _round_up(max(cols, 1), 128) * itemsize


def _pick_cblk(nc, hw, out_cols, in_isz, out_isz, budget):
    """Largest channel-block whose true (tile-padded) footprint fits `budget`."""
    # Tile-padded bytes for an 8-channel sliver, double-buffered in/out/params,
    # plus single-buffered f32 temps (FMA result + border splat headroom).
    per_8 = (2 * (_tile_bytes(8, hw, in_isz)            # input block
                  + _tile_bytes(8, out_cols, out_isz)   # output block
                  + _tile_bytes(8, 2, 4))               # fused scale/shift block
             + _tile_bytes(8, hw, 4)                    # f32 FMA result staged in VMEM
             + _tile_bytes(8, out_cols, 4))             # headroom for the fill value
    per_c = max(1, per_8 // 8)

    max_c = max(8, (budget // per_c) // 8 * 8)
    if nc <= max_c:
        return nc                                       # single full-extent block

    # Prefer >= ~8 grid steps (keeps both v7x TensorCores fed) while keeping
    # each block's logical HBM traffic >= ~1 MiB to amortize per-step overhead.
    logical_per_c = max(1, hw * in_isz + out_cols * out_isz)
    min_c = max(8, min(max_c, ((1 << 20) // logical_per_c) // 8 * 8))
    want = _round_up(-(-nc // 8), 8)                    # cblk giving ~8 steps
    return max(8, min(max_c, max(min_c, want)))


# ---------------------------------------------------------------------------
# Public wrapper
# ---------------------------------------------------------------------------

def bn_and_pad(x, weight, bias, running_mean, running_var, *,
               eps=1e-5, pad_pixels=1):
    N, C, H, W = x.shape
    pad = int(pad_pixels)
    Hp, Wp = H + 2 * pad, W + 2 * pad
    NC, HW, HPWP = N * C, H * W, Hp * Wp

    inv_std = jax.lax.rsqrt(running_var.astype(jnp.float32) + jnp.float32(eps))
    if weight is None:                                  # affine=False path
        scale = inv_std
        shift = -running_mean.astype(jnp.float32) * inv_std
    else:
        scale = weight.astype(jnp.float32) * inv_std
        shift = bias.astype(jnp.float32) - running_mean.astype(jnp.float32) * scale

    # Fused per-(n, c) parameters: (NC, 2) with [:,0]=scale, [:,1]=shift.
    params = jnp.stack([jnp.tile(scale, N), jnp.tile(shift, N)], axis=1)

    # Channels-on-sublanes / flattened-spatial-on-lanes view (free reshape of
    # contiguous NCHW).
    x2 = x.reshape(NC, HW)

    in_isz = jnp.dtype(x.dtype).itemsize
    out_isz = in_isz
    out_cols = HPWP if pad > 0 else HW

    # Generation-aware VMEM budgeting (v7x: 64 MiB physical; v5e/v6e: 128 MiB).
    try:
        phys_vmem = int(pltpu.get_tpu_info().vmem_capacity_bytes)
    except Exception:                                   # pragma: no cover
        phys_vmem = 64 * 1024 * 1024                    # conservative (v7x-sized)
    budget = max(8 << 20, (phys_vmem * 3) // 8)         # ~24 MiB v7x, ~48 MiB v5e/v6e
    vmem_limit = max(32 << 20, min(phys_vmem - (8 << 20), (phys_vmem * 5) // 8))

    cblk = _pick_cblk(NC, HW, out_cols, in_isz, out_isz, budget)
    grid = (pl.cdiv(NC, cblk),)

    cost = pl.CostEstimate(
        flops=2 * NC * HW,
        transcendentals=0,
        bytes_accessed=NC * HW * in_isz + NC * out_cols * out_isz + NC * 2 * 4,
    )

    if pad == 0:
        kernel = _bn_kernel
    else:
        kernel = functools.partial(_bn_pad_kernel, pad=pad, H=H, W=W)

    out_flat = pl.pallas_call(
        kernel,
        out_shape=jax.ShapeDtypeStruct((NC, out_cols), x.dtype),
        grid=grid,
        in_specs=[
            pl.BlockSpec((cblk, HW), lambda i: (i, 0)),
            pl.BlockSpec((cblk, 2), lambda i: (i, 0)),
        ],
        out_specs=pl.BlockSpec((cblk, out_cols), lambda i: (i, 0)),
        compiler_params=pltpu.CompilerParams(
            dimension_semantics=("parallel",),
            vmem_limit_bytes=int(vmem_limit)),
        cost_estimate=cost,
    )(x2, params)

    if pad > 0:
        return out_flat.reshape(N, C, Hp, Wp)
    return out_flat.reshape(N, C, H, W)


# ---------------------------------------------------------------------------
# Pure-JAX reference (mirrors the PyTorch forward, eval-mode BN)
# ---------------------------------------------------------------------------

def _reference(x, weight, bias, running_mean, running_var, eps, pad):
    rm = running_mean[None, :, None, None]
    rv = running_var[None, :, None, None]
    xhat = (x - rm) / jnp.sqrt(rv + eps)
    if weight is not None:
        out = xhat * weight[None, :, None, None] + bias[None, :, None, None]
        pad_vec = bias - running_mean * weight / jnp.sqrt(running_var + eps)
    else:
        out = xhat
        pad_vec = -running_mean / jnp.sqrt(running_var + eps)
    if pad > 0:
        pv = pad_vec[None, :, None, None]
        out = jnp.pad(out, ((0, 0), (0, 0), (pad, pad), (pad, pad)))
        out = out.at[:, :, 0:pad, :].set(pv)
        out = out.at[:, :, -pad:, :].set(pv)
        out = out.at[:, :, :, 0:pad].set(pv)
        out = out.at[:, :, :, -pad:].set(pv)
    return out


if __name__ == "__main__":
    N, C, H, W = 2, 4, 16, 16
    eps = 1e-5

    key = jax.random.PRNGKey(0)
    kx, kw, kb, km, kv = jax.random.split(key, 5)

    x = jax.random.normal(kx, (N, C, H, W), dtype=jnp.float32)
    weight = 1.0 + 0.1 * jax.random.normal(kw, (C,), dtype=jnp.float32)
    bias = 0.1 * jax.random.normal(kb, (C,), dtype=jnp.float32)
    running_mean = 0.05 * jax.random.normal(km, (C,), dtype=jnp.float32)
    running_var = 1.0 + 0.2 * jax.random.uniform(kv, (C,), dtype=jnp.float32)

    # Affine BN + pad_pixels=1 (the module's default configuration).
    out = jax.block_until_ready(
        bn_and_pad(x, weight, bias, running_mean, running_var,
                   eps=eps, pad_pixels=1))
    ref = _reference(x, weight, bias, running_mean, running_var, eps, 1)
    assert out.shape == (N, C, H + 2, W + 2)
    assert jnp.allclose(out, ref, atol=1e-5, rtol=1e-5), "pad=1 mismatch"

    # pad_pixels=0 path.
    out0 = jax.block_until_ready(
        bn_and_pad(x, weight, bias, running_mean, running_var,
                   eps=eps, pad_pixels=0))
    ref0 = _reference(x, weight, bias, running_mean, running_var, eps, 0)
    assert out0.shape == (N, C, H, W)
    assert jnp.allclose(out0, ref0, atol=1e-5, rtol=1e-5), "pad=0 mismatch"

    # affine=False path (weight/bias = None).
    outna = jax.block_until_ready(
        bn_and_pad(x, None, None, running_mean, running_var,
                   eps=eps, pad_pixels=1))
    refna = _reference(x, None, None, running_mean, running_var, eps, 1)
    assert jnp.allclose(outna, refna, atol=1e-5, rtol=1e-5), "affine=False mismatch"

    print("KERNEL_OK")
</pallas_src>

<mosaic_0001>
module attributes {stable_mosaic.version = 11 : i64} {
  func.func @_bn_pad_kernel(%arg0: i32, %arg1: memref<8x256xf32, #tpu.memory_space<vmem>>, %arg2: memref<8x2xf32, #tpu.memory_space<vmem>>, %arg3: memref<8x324xf32, #tpu.memory_space<vmem>>) attributes {dimension_semantics = [#tpu.dimension_semantics<parallel>], iteration_bounds = array<i64: 1>, scalar_prefetch = 0 : i64, scratch_operands = 0 : i64, tpu.core_type = #tpu.core_type<tc>, window_params = [{transform_indices = @transform_0, window_bounds = array<i64: 8, 256>}, {transform_indices = @transform_1, window_bounds = array<i64: 8, 2>}, {transform_indices = @transform_2, window_bounds = array<i64: 8, 324>}]} {
    %c0 = arith.constant 0 : index
    %c0_0 = arith.constant 0 : index
    %0 = vector.load %arg2[%c0, %c0_0] : memref<8x2xf32, #tpu.memory_space<vmem>>, vector<8x1xf32>
    %c0_1 = arith.constant 0 : index
    %c1 = arith.constant 1 : index
    %1 = vector.load %arg2[%c0_1, %c1] : memref<8x2xf32, #tpu.memory_space<vmem>>, vector<8x1xf32>
    %c0_2 = arith.constant 0 : index
    %c0_3 = arith.constant 0 : index
    %2 = vector.load %arg1[%c0_2, %c0_3] : memref<8x256xf32, #tpu.memory_space<vmem>>, vector<8x256xf32>
    %3 = vector.broadcast %0 : vector<8x1xf32> to vector<8x256xf32>
    %4 = arith.mulf %2, %3 : vector<8x256xf32>
    %5 = vector.broadcast %1 : vector<8x1xf32> to vector<8x256xf32>
    %6 = arith.addf %4, %5 : vector<8x256xf32>
    %7 = vector.shape_cast %1 : vector<8x1xf32> to vector<8x1xf32>
    %8 = vector.broadcast %7 : vector<8x1xf32> to vector<8x324xf32>
    %c0_4 = arith.constant 0 : index
    %c0_5 = arith.constant 0 : index
    %9 = vector.load %arg3[%c0_4, %c0_5] : memref<8x324xf32, #tpu.memory_space<vmem>>, vector<8x324xf32>
    tpu.vector_store %arg3[%c0_4, %c0_5], %8 {strides = array<i32>} : memref<8x324xf32, #tpu.memory_space<vmem>>, vector<8x324xf32>,
    %10 = vector.extract_strided_slice %6 {offsets = [0, 0], sizes = [8, 16], strides = [1, 1]} : vector<8x256xf32> to vector<8x16xf32>
    %c0_6 = arith.constant 0 : index
    %c19 = arith.constant 19 : index
    %11 = vector.load %arg3[%c0_6, %c19] : memref<8x324xf32, #tpu.memory_space<vmem>>, vector<8x16xf32>
    tpu.vector_store %arg3[%c0_6, %c19], %10 {strides = array<i32>} : memref<8x324xf32, #tpu.memory_space<vmem>>, vector<8x16xf32>,
    %12 = vector.extract_strided_slice %6 {offsets = [0, 16], sizes = [8, 16], strides = [1, 1]} : vector<8x256xf32> to vector<8x16xf32>
    %c0_7 = arith.constant 0 : index
    %c37 = arith.constant 37 : index
    %13 = vector.load %arg3[%c0_7, %c37] : memref<8x324xf32, #tpu.memory_space<vmem>>, vector<8x16xf32>
    tpu.vector_store %arg3[%c0_7, %c37], %12 {strides = array<i32>} : memref<8x324xf32, #tpu.memory_space<vmem>>, vector<8x16xf32>,
    %14 = vector.extract_strided_slice %6 {offsets = [0, 32], sizes = [8, 16], strides = [1, 1]} : vector<8x256xf32> to vector<8x16xf32>
    %c0_8 = arith.constant 0 : index
    %c55 = arith.constant 55 : index
    %15 = vector.load %arg3[%c0_8, %c55] : memref<8x324xf32, #tpu.memory_space<vmem>>, vector<8x16xf32>
    tpu.vector_store %arg3[%c0_8, %c55], %14 {strides = array<i32>} : memref<8x324xf32, #tpu.memory_space<vmem>>, vector<8x16xf32>,
    %16 = vector.extract_strided_slice %6 {offsets = [0, 48], sizes = [8, 16], strides = [1, 1]} : vector<8x256xf32> to vector<8x16xf32>
    %c0_9 = arith.constant 0 : index
    %c73 = arith.constant 73 : index
    %17 = vector.load %arg3[%c0_9, %c73] : memref<8x324xf32, #tpu.memory_space<vmem>>, vector<8x16xf32>
    tpu.vector_store %arg3[%c0_9, %c73], %16 {strides = array<i32>} : memref<8x324xf32, #tpu.memory_space<vmem>>, vector<8x16xf32>,
    %18 = vector.extract_strided_slice %6 {offsets = [0, 64], sizes = [8, 16], strides = [1, 1]} : vector<8x256xf32> to vector<8x16xf32>
    %c0_10 = arith.constant 0 : index
    %c91 = arith.constant 91 : index
    %19 = vector.load %arg3[%c0_10, %c91] : memref<8x324xf32, #tpu.memory_space<vmem>>, vector<8x16xf32>
    tpu.vector_store %arg3[%c0_10, %c91], %18 {strides = array<i32>} : memref<8x324xf32, #tpu.memory_space<vmem>>, vector<8x16xf32>,
    %20 = vector.extract_strided_slice %6 {offsets = [0, 80], sizes = [8, 16], strides = [1, 1]} : vector<8x256xf32> to vector<8x16xf32>
    %c0_11 = arith.constant 0 : index
    %c109 = arith.constant 109 : index
    %21 = vector.load %arg3[%c0_11, %c109] : memref<8x324xf32, #tpu.memory_space<vmem>>, vector<8x16xf32>
    tpu.vector_store %arg3[%c0_11, %c109], %20 {strides = array<i32>} : memref<8x324xf32, #tpu.memory_space<vmem>>, vector<8x16xf32>,
    %22 = vector.extract_strided_slice %6 {offsets = [0, 96], sizes = [8, 16], strides = [1, 1]} : vector<8x256xf32> to vector<8x16xf32>
    %c0_12 = arith.constant 0 : index
    %c127 = arith.constant 127 : index
    %23 = vector.load %arg3[%c0_12, %c127] : memref<8x324xf32, #tpu.memory_space<vmem>>, vector<8x16xf32>
    tpu.vector_store %arg3[%c0_12, %c127], %22 {strides = array<i32>} : memref<8x324xf32, #tpu.memory_space<vmem>>, vector<8x16xf32>,
    %24 = vector.extract_strided_slice %6 {offsets = [0, 112], sizes = [8, 16], strides = [1, 1]} : vector<8x256xf32> to vector<8x16xf32>
    %c0_13 = arith.constant 0 : index
    %c145 = arith.constant 145 : index
    %25 = vector.load %arg3[%c0_13, %c145] : memref<8x324xf32, #tpu.memory_space<vmem>>, vector<8x16xf32>
    tpu.vector_store %arg3[%c0_13, %c145], %24 {strides = array<i32>} : memref<8x324xf32, #tpu.memory_space<vmem>>, vector<8x16xf32>,
    %26 = vector.extract_strided_slice %6 {offsets = [0, 128], sizes = [8, 16], strides = [1, 1]} : vector<8x256xf32> to vector<8x16xf32>
    %c0_14 = arith.constant 0 : index
    %c163 = arith.constant 163 : index
    %27 = vector.load %arg3[%c0_14, %c163] : memref<8x324xf32, #tpu.memory_space<vmem>>, vector<8x16xf32>
    tpu.vector_store %arg3[%c0_14, %c163], %26 {strides = array<i32>} : memref<8x324xf32, #tpu.memory_space<vmem>>, vector<8x16xf32>,
    %28 = vector.extract_strided_slice %6 {offsets = [0, 144], sizes = [8, 16], strides = [1, 1]} : vector<8x256xf32> to vector<8x16xf32>
    %c0_15 = arith.constant 0 : index
    %c181 = arith.constant 181 : index
    %29 = vector.load %arg3[%c0_15, %c181] : memref<8x324xf32, #tpu.memory_space<vmem>>, vector<8x16xf32>
    tpu.vector_store %arg3[%c0_15, %c181], %28 {strides = array<i32>} : memref<8x324xf32, #tpu.memory_space<vmem>>, vector<8x16xf32>,
    %30 = vector.extract_strided_slice %6 {offsets = [0, 160], sizes = [8, 16], strides = [1, 1]} : vector<8x256xf32> to vector<8x16xf32>
    %c0_16 = arith.constant 0 : index
    %c199 = arith.constant 199 : index
    %31 = vector.load %arg3[%c0_16, %c199] : memref<8x324xf32, #tpu.memory_space<vmem>>, vector<8x16xf32>
    tpu.vector_store %arg3[%c0_16, %c199], %30 {strides = array<i32>} : memref<8x324xf32, #tpu.memory_space<vmem>>, vector<8x16xf32>,
    %32 = vector.extract_strided_slice %6 {offsets = [0, 176], sizes = [8, 16], strides = [1, 1]} : vector<8x256xf32> to vector<8x16xf32>
    %c0_17 = arith.constant 0 : index
    %c217 = arith.constant 217 : index
    %33 = vector.load %arg3[%c0_17, %c217] : memref<8x324xf32, #tpu.memory_space<vmem>>, vector<8x16xf32>
    tpu.vector_store %arg3[%c0_17, %c217], %32 {strides = array<i32>} : memref<8x324xf32, #tpu.memory_space<vmem>>, vector<8x16xf32>,
    %34 = vector.extract_strided_slice %6 {offsets = [0, 192], sizes = [8, 16], strides = [1, 1]} : vector<8x256xf32> to vector<8x16xf32>
    %c0_18 = arith.constant 0 : index
    %c235 = arith.constant 235 : index
    %35 = vector.load %arg3[%c0_18, %c235] : memref<8x324xf32, #tpu.memory_space<vmem>>, vector<8x16xf32>
    tpu.vector_store %arg3[%c0_18, %c235], %34 {strides = array<i32>} : memref<8x324xf32, #tpu.memory_space<vmem>>, vector<8x16xf32>,
    %36 = vector.extract_strided_slice %6 {offsets = [0, 208], sizes = [8, 16], strides = [1, 1]} : vector<8x256xf32> to vector<8x16xf32>
    %c0_19 = arith.constant 0 : index
    %c253 = arith.constant 253 : index
    %37 = vector.load %arg3[%c0_19, %c253] : memref<8x324xf32, #tpu.memory_space<vmem>>, vector<8x16xf32>
    tpu.vector_store %arg3[%c0_19, %c253], %36 {strides = array<i32>} : memref<8x324xf32, #tpu.memory_space<vmem>>, vector<8x16xf32>,
    %38 = vector.extract_strided_slice %6 {offsets = [0, 224], sizes = [8, 16], strides = [1, 1]} : vector<8x256xf32> to vector<8x16xf32>
    %c0_20 = arith.constant 0 : index
    %c271 = arith.constant 271 : index
    %39 = vector.load %arg3[%c0_20, %c271] : memref<8x324xf32, #tpu.memory_space<vmem>>, vector<8x16xf32>
    tpu.vector_store %arg3[%c0_20, %c271], %38 {strides = array<i32>} : memref<8x324xf32, #tpu.memory_space<vmem>>, vector<8x16xf32>,
    %40 = vector.extract_strided_slice %6 {offsets = [0, 240], sizes = [8, 16], strides = [1, 1]} : vector<8x256xf32> to vector<8x16xf32>
    %c0_21 = arith.constant 0 : index
    %c289 = arith.constant 289 : index
    %41 = vector.load %arg3[%c0_21, %c289] : memref<8x324xf32, #tpu.memory_space<vmem>>, vector<8x16xf32>
    tpu.vector_store %arg3[%c0_21, %c289], %40 {strides = array<i32>} : memref<8x324xf32, #tpu.memory_space<vmem>>, vector<8x16xf32>,
    return
  }
  func.func @transform_0(%arg0: i32) -> (i32, i32) {
    %c0_i32 = arith.constant 0 : i32
    %c0_i32_0 = arith.constant 0 : i32
    return %arg0, %c0_i32 : i32, i32
  }
  func.func @transform_1(%arg0: i32) -> (i32, i32) {
    %c0_i32 = arith.constant 0 : i32
    %c0_i32_0 = arith.constant 0 : i32
    return %arg0, %c0_i32 : i32, i32
  }
  func.func @transform_2(%arg0: i32) -> (i32, i32) {
    %c0_i32 = arith.constant 0 : i32
    %c0_i32_0 = arith.constant 0 : i32
    return %arg0, %c0_i32 : i32, i32
  }
}

</mosaic_0001>

<bundles_post_ra>
// kernel: tpu_custom_call.1
= control target key start
LH: loop header
LB: loop body
LE: loop exit
PB: predicated region body
PF: predicated region fallthrough
CT: control target
= control target key end

     0   :  { %7 = vsyncpa [#allocation3], 0  ;;  %s255_s0 = inlined_call_operand.hbm [shape: f32[8,256], index: 0, kind: input, shape index: {}]   ;;  %s256_s1 = inlined_call_operand.vmem [shape: f32[8,2], index: 1, kind: input, shape index: {}]   ;;  %s257_s2 = inlined_call_operand.hbm [shape: f32[8,324], index: 2, kind: output, shape index: {}]  }
   0x1   :  { %8 = vsyncpa [#allocation4], 0  ;;  %s211_s9 = smov [#allocation2]  }
   0x2   :  { %s15_s10 = sshll.u32 %s211_s9, 4  ;;  %s16_s10 = int_to_ptr.vmem [resolvable:$true] %s15_s10 }
   0x3   :  { %s175_s11 = scalar_lea.vmem %s16_s10, 256  ;;  %p180_p1 = scmp.lt.s32.totalorder %s16_s10, %s16_s10 }
   0x4   :  { %p176_p0 = scmp.ne.s32.totalorder %s16_s10, %s175_s11  ;;  %p181_p2 = scmp.lt.s32.totalorder %s175_s11, %s175_s11 }
   0x6   :  { %p182_p3 = por %p181_p2, %p180_p1 }
   0x8   :  { %p183_p4 = pnand %p182_p3, %p176_p0 }
   0xa   :  { %186 = shalt.err (!%p183_p4)
}
   0xb   :  { %18 = dma.hbm_to_vmem [thread:$0]  %s255_s0, 256, %s16_s10, [#allocation3]  }
   0xc   :  { %207 = dma.done.wait [#allocation3], 256  }
   0xd   :  { %208 = vsyncadd [#allocation3], 4294967040  ;;  %v212_v0 = vmov 0   ;;  %v24_v1 = vld [vmem:[%s256_s1] sm:$0xff]  ;;  %v213_v2 = vmov 1   ;;  %vm42_vm0 = vcmask 556032  }
   0xe   :  { %165 = vset.pattern.permute.xlu0 %v212_v0  ;;  %v25_v4 = vld [vmem:[#allocation2] sm:$0xff]  ;;  %s214_s0 = smov 21   ;;  %s215_s16 = smov 31   ;;  %v26_v8 = vld [vmem:[#allocation2 + $0x8] sm:$0xff]  ;;  %vm80_vm1 = vcmask 121856   ;;  %vm48_vm2 = vcmask 285848  }
   0xf   :  { %29 = vperm.xlu0 %165, %v24_v1   ;;  %s216_s17 = smov 23   ;;  %s217_s1 = smov 19   ;;  %vm53_vm3 = vcmask 433448   ;;  %vm58_vm4 = vcmask 581048   ;;  %vm63_vm5 = vcmask 728648   ;;  %vm85_vm6 = vcmask 269448  }
  0x10   :  { %s218_s18 = smov 25   ;;  %s219_s19 = smov 33   ;;  %vm68_vm7 = vcmask 876248   ;;  %vm91_vm8 = vcmask 417048   ;;  %vm118_vm9 = vcmask 105472   ;;  %vm96_vm10 = vcmask 564648  }
  0x11   :  { %s220_s20 = smov 27   ;;  %s221_s21 = smov 35   ;;  %vm101_vm11 = vcmask 712248   ;;  %vm106_vm12 = vcmask 859848   ;;  %vm111_vm13 = vcmask 1007448   ;;  %vm116_vm14 = vcmask 1048552  }
  0x12   :  { %s222_s22 = smov 45   ;;  %s223_s23 = smov 37   ;;  %vm73_vm15 = vcmask 1023848  }
  0x13   :  { %166 = vset.pattern.permute.xlu0 %v213_v2  ;;  %s224_s24 = smov 43   ;;  %s225_s25 = smov 39  }
  0x14   :  { %35 = vperm.xlu0 %166, %v24_v1   ;;  %s226_s26 = smov 49   ;;  %s227_s27 = smov 41  }
  0x15   :  { %s228_s28 = smov 29   ;;  %s229_s29 = smov 47  }
  0x16   :  { %s230_s30 = smov [#allocation5]  }
  0x17   :  { %s136_s3 = sshll.u32 %s230_s30, 4  ;;  %s137_s3 = int_to_ptr.vmem [resolvable:$true] %s136_s3 }
  0x18   :  { %s187_s4 = scalar_lea.vmem %s137_s3, 384  ;;  %p192_p6 = scmp.lt.s32.totalorder %s137_s3, %s137_s3 }
  0x19   :  { %p188_p5 = scmp.ne.s32.totalorder %s137_s3, %s187_s4  ;;  %p193_p7 = scmp.lt.s32.totalorder %s187_s4, %s187_s4 }
  0x1b   :  { %p194_p8 = por %p193_p7, %p192_p6 }
  0x1d   :  { %p195_p9 = pnand %p194_p8, %p188_p5 }
  0x8a   :  { %v30_v3 = vpop.permute.xlu0 %29 }
  0x8b   :  { %v32_v5 = vmul.f32 %v30_v3, %v25_v4  ;;  %v33_v9 = vmul.f32 %v30_v3, %v26_v8 }
  0x8f   :  { %v36_v6 = vpop.permute.xlu0 %35 }
  0x90   :  { %v38_v7 = vadd.f32 %v36_v6, %v32_v5  ;;  %40 = vst [vmem:[#allocation5] sm:$0xff] %v36_v6  ;;  %41 = vst [vmem:[#allocation5 + $0x8] sm:$0xff] %v36_v6  ;;  %v39_v10 = vadd.f32 %v36_v6, %v33_v9 }
  0x91   :  { %43 = vst.msk [vmem:[#allocation5 + $0x10] sm:$0xff] %vm42_vm0, %v36_v6  ;;  %vm78_vm0 = vcmask 1048568  }
  0x92   :  { %50 = vrot.lane.b32.xlu0 %v38_v7, %s214_s0  ;;  %75 = vrot.lane.b32.xlu1 %v38_v7, %s215_s16 }
  0x96   :  { %55 = vrot.lane.b32.xlu0 %v38_v7, %s216_s17  ;;  %45 = vrot.lane.b32.xlu1 %v38_v7, %s217_s1 }
  0x9a   :  { %60 = vrot.lane.b32.xlu0 %v38_v7, %s218_s18  ;;  %82 = vrot.lane.b32.xlu1 %v38_v7, %s219_s19 }
  0x9e   :  { %65 = vrot.lane.b32.xlu0 %v38_v7, %s220_s20  ;;  %88 = vrot.lane.b32.xlu1 %v39_v10, %s221_s21 }
  0xa2   :  { %113 = vrot.lane.b32.xlu0 %v39_v10, %s222_s22  ;;  %93 = vrot.lane.b32.xlu1 %v39_v10, %s223_s23 }
  0xa6   :  { %108 = vrot.lane.b32.xlu0 %v39_v10, %s224_s24  ;;  %98 = vrot.lane.b32.xlu1 %v39_v10, %s225_s25 }
  0xaa   :  { %125 = vrot.lane.b32.xlu0 %v39_v10, %s226_s26  ;;  %103 = vrot.lane.b32.xlu1 %v39_v10, %s227_s27 }
  0xae   :  { %70 = vrot.lane.b32.xlu1 %v38_v7, %s228_s28 }
  0xb2   :  { %120 = vrot.lane.b32.xlu1 %v39_v10, %s229_s29 }
 0x104   :  { %v51_v11 = vpop.permute.xlu0 %50  ;;  %v76_v12 = vpop.permute.xlu1 %75 }
 0x105   :  { %81 = vst.msk [vmem:[#allocation5 + $0x8] sm:$0xff] %vm80_vm1, %v76_v12  ;;  %vm123_vm1 = vcmask 253048  }
 0x108   :  { %v56_v13 = vpop.permute.xlu0 %55  ;;  %v46_v14 = vpop.permute.xlu1 %45 }
 0x109   :  { %49 = vst.msk [vmem:[#allocation5] sm:$0xff] %vm48_vm2, %v46_v14  ;;  %vm128_vm2 = vcmask 400648  }
 0x10a   :  { %54 = vst.msk [vmem:[#allocation5] sm:$0xff] %vm53_vm3, %v51_v11 }
 0x10b   :  { %59 = vst.msk [vmem:[#allocation5] sm:$0xff] %vm58_vm4, %v56_v13 }
 0x10c   :  { %v61_v15 = vpop.permute.xlu0 %60  ;;  %v83_v16 = vpop.permute.xlu1 %82 }
 0x10d   :  { %64 = vst.msk [vmem:[#allocation5] sm:$0xff] %vm63_vm5, %v61_v15 }
 0x10e   :  { %86 = vst.msk [vmem:[#allocation5 + $0x8] sm:$0xff] %vm85_vm6, %v83_v16 }
 0x110   :  { %v66_v17 = vpop.permute.xlu0 %65  ;;  %v89_v18 = vpop.permute.xlu1 %88 }
 0x111   :  { %69 = vst.msk [vmem:[#allocation5] sm:$0xff] %vm68_vm7, %v66_v17 }
 0x112   :  { %92 = vst.msk [vmem:[#allocation5 + $0x8] sm:$0xff] %vm91_vm8, %v89_v18 }
 0x114   :  { %v114_v19 = vpop.permute.xlu0 %113  ;;  %v94_v20 = vpop.permute.xlu1 %93 }
 0x115   :  { %119 = vst.msk [vmem:[#allocation5 + $0x10] sm:$0xff] %vm118_vm9, %v114_v19 }
 0x116   :  { %97 = vst.msk [vmem:[#allocation5 + $0x8] sm:$0xff] %vm96_vm10, %v94_v20 }
 0x118   :  { %v99_v21 = vpop.permute.xlu1 %98  ;;  %v109_v23 = vpop.permute.xlu0 %108 }
 0x119   :  { %102 = vst.msk [vmem:[#allocation5 + $0x8] sm:$0xff] %vm101_vm11, %v99_v21 }
 0x11c   :  { %v104_v22 = vpop.permute.xlu1 %103  ;;  %v126_v26 = vpop.permute.xlu0 %125 }
 0x11d   :  { %107 = vst.msk [vmem:[#allocation5 + $0x8] sm:$0xff] %vm106_vm12, %v104_v22 }
 0x11e   :  { %112 = vst.msk [vmem:[#allocation5 + $0x8] sm:$0xff] %vm111_vm13, %v109_v23 }
 0x11f   :  { %117 = vst.msk [vmem:[#allocation5 + $0x8] sm:$0xff] %vm116_vm14, %v114_v19 }
 0x120   :  { %v71_v24 = vpop.permute.xlu1 %70 }
 0x121   :  { %74 = vst.msk [vmem:[#allocation5] sm:$0xff] %vm73_vm15, %v71_v24 }
 0x122   :  { %79 = vst.msk [vmem:[#allocation5] sm:$0xff] %vm78_vm0, %v76_v12 }
 0x124   :  { %v121_v25 = vpop.permute.xlu1 %120 }
 0x125   :  { %124 = vst.msk [vmem:[#allocation5 + $0x10] sm:$0xff] %vm123_vm1, %v121_v25 }
 0x126   :  { %129 = vst.msk [vmem:[#allocation5 + $0x10] sm:$0xff] %vm128_vm2, %v126_v26 }
 0x127   :  { %198 = shalt.err (!%p195_p9)
}
 0x128   :  { %139 = dma.vmem_to_hbm [thread:$0]  %s137_s3, 384, %s257_s2, [#allocation4]  }
 0x129   :  { %209 = dma.done.wait [#allocation4], 384  }
 0x12a   :  { %210 = vsyncadd [#allocation4], 4294966912 }
 0x12b   :  { %143 = vsyncpa [#allocation3], 1 }
 0x12c   :  { %144 = vsyncpa [#allocation4], 1 }

</bundles_post_ra>
